<compile_context>
chip_gen: v5e
topology: v5e:2x2
jax: 0.10.0
libtpu: 0.0.40
codegen_flags: <defaults>
</compile_context>

<pallas_src>
import math
import functools

import jax
import jax.numpy as jnp
from jax import lax
from jax.experimental import pallas as pl
from jax.experimental.pallas import tpu as pltpu


def mha_kernel(q_ref, k_ref, v_ref, mask_ref,
               wq_ref, bq_ref, wk_ref, bk_ref, wv_ref, bv_ref,
               wo_ref, bo_ref, gamma_ref, beta_ref,
               out_ref,
               k_sc, v_sc, q_sc, ctx_sc, bias_sc,
               *, n_head, d_k, head_chunk, eps):
    cdt = wq_ref.dtype                       # MXU compute dtype (bf16)

    # ---- Per batch element (query tile 0): project K/V once, cache head-major
    #      in VMEM; cache the additive mask bias.
    @pl.when(pl.program_id(1) == 0)
    def _():
        kp = jnp.dot(k_ref[0], wk_ref[...],
                     preferred_element_type=jnp.float32) + bk_ref[...]
        vp = jnp.dot(v_ref[0], wv_ref[...],
                     preferred_element_type=jnp.float32) + bv_ref[...]
        for h in range(n_head):              # static unroll
            sl = slice(h * d_k, (h + 1) * d_k)
            k_sc[h] = kp[:, sl].astype(cdt)
            v_sc[h] = vp[:, sl].astype(cdt)
        bias_sc[...] = jnp.where(mask_ref[0] == 0,
                                 jnp.float32(-1e9), jnp.float32(0.0))  # [1, Lk]

    # ---- Q projection for this query tile; fold 1/sqrt(d_k) into qp.
    q_res = q_ref[0]                         # f32 original query, for the residual
    qp = (jnp.dot(q_res.astype(cdt), wq_ref[...],
                  preferred_element_type=jnp.float32) + bq_ref[...])
    qp = qp * jnp.float32(1.0 / math.sqrt(d_k))
    for h in range(n_head):
        q_sc[h] = qp[:, h * d_k:(h + 1) * d_k].astype(cdt)

    bias = bias_sc[...]                      # [1, Lk] additive mask bias

    # ---- Attention, heads processed in chunks (bounds live [hc,TQ,Lk] f32).
    for c0 in range(0, n_head, head_chunk):
        c1 = min(c0 + head_chunk, n_head)
        qh = q_sc[c0:c1]                     # [hc, TQ, d_k] bf16
        kh = k_sc[c0:c1]                     # [hc, Lk, d_k] bf16
        vh = v_sc[c0:c1]                     # [hc, Lk, d_k] bf16

        s = jnp.einsum('hqd,hkd->hqk', qh, kh,
                       preferred_element_type=jnp.float32)            # [hc, TQ, Lk]
        s = s + bias                                                   # bcast over (hc, TQ)
        s = s - jnp.max(s, axis=-1, keepdims=True)                     # stable softmax
        p = jnp.exp(s)
        p = p * pl.reciprocal(jnp.sum(p, axis=-1, keepdims=True), approx=True)

        o = jnp.einsum('hqk,hkd->hqd', p.astype(cdt), vh,
                       preferred_element_type=jnp.float32)             # [hc, TQ, d_k]
        for h in range(c0, c1):
            ctx_sc[:, h * d_k:(h + 1) * d_k] = o[h - c0].astype(cdt)

    # ---- Wo projection, residual, LayerNorm (vector math in f32).
    multi = jnp.dot(ctx_sc[...], wo_ref[...],
                    preferred_element_type=jnp.float32) + bo_ref[...]
    # TODO(synk): Dropout(p=0.01) is identity in eval mode; training-mode dropout not implemented.
    resdl = q_res + multi
    mu = jnp.mean(resdl, axis=-1, keepdims=True)
    var = jnp.mean((resdl - mu) ** 2, axis=-1, keepdims=True)
    normed = (resdl - mu) * lax.rsqrt(var + eps)
    out_ref[0] = (normed * gamma_ref[...] + beta_ref[...]).astype(out_ref.dtype)


def _pick_q_tile(L):
    """Generation-aware query-tile size (smaller on 64 MiB-VMEM parts)."""
    tq = 256
    try:
        if pltpu.get_tpu_info().vmem_capacity_bytes <= 64 * 1024 * 1024:
            tq = 128
    except Exception:
        pass
    return min(L, tq)


def _pick_head_chunk(n_head, tq, Lk):
    """Chunk heads so the live f32 score/prob block stays ~<=16 MiB."""
    budget = 16 * 1024 * 1024
    per_head = 3 * tq * Lk * 4
    return int(max(1, min(n_head, budget // max(per_head, 1))))


def _vmem_limit_bytes(L, Lk, d_m, n_head, d_k, tq, head_chunk):
    f32, bf16 = 4, 2
    bufs = 2 * tq * d_m * f32              # q block, double-buffered
    bufs += 2 * 2 * Lk * d_m * bf16        # k, v blocks (bf16), double-buffered
    bufs += 2 * tq * d_m * f32             # out block, double-buffered
    bufs += Lk * f32                       # mask (single-buffered)
    bufs += 4 * d_m * d_m * bf16           # weights (single-buffered)
    bufs += 6 * d_m * f32                  # biases / gamma / beta
    scratch = (2 * n_head * Lk * d_k * bf16   # k_sc, v_sc
               + n_head * tq * d_k * bf16     # q_sc
               + tq * d_m * bf16              # ctx_sc
               + Lk * f32)                    # bias_sc
    live = head_chunk * tq * Lk * (2 * f32 + bf16) + 3 * tq * d_m * f32
    est = int(1.25 * (bufs + scratch + live))
    return max(32 * 1024 * 1024, min(est, 100 * 1024 * 1024))


def prepare_params(params, compute_dtype=jnp.bfloat16):
    """Cast weight matrices to the MXU compute dtype ONCE (not per call)."""
    out = dict(params)
    for name in ("wq", "wk", "wv", "wo"):
        out[name] = params[name].astype(compute_dtype)
    return out


def multi_head_attention(query, key, value, mask, params, *, n_head,
                         eps=1e-6, compute_dtype=jnp.bfloat16):
    B, L, d_m = query.shape
    Lk = key.shape[1]
    assert d_m % n_head == 0
    d_k = d_m // n_head

    tq = _pick_q_tile(L)
    n_qt = pl.cdiv(L, tq)
    head_chunk = _pick_head_chunk(n_head, tq, Lk)

    def _as(x, dt):
        return x if x.dtype == dt else x.astype(dt)

    # K/V only feed bf16 MXU matmuls -> ship them as bf16 (half the DMA bytes).
    key = _as(key, compute_dtype)
    value = _as(value, compute_dtype)
    wq = _as(params["wq"], compute_dtype)
    wk = _as(params["wk"], compute_dtype)
    wv = _as(params["wv"], compute_dtype)
    wo = _as(params["wo"], compute_dtype)

    kernel = functools.partial(mha_kernel, n_head=n_head, d_k=d_k,
                               head_chunk=head_chunk, eps=eps)

    single = pl.Buffered(1)   # grid-invariant operands: no double-buffering
    q_spec = pl.BlockSpec((1, tq, d_m), lambda b, t: (b, t, 0))
    kv_spec = pl.BlockSpec((1, Lk, d_m), lambda b, t: (b, 0, 0))
    mask_spec = pl.BlockSpec((1, 1, Lk), lambda b, t: (b, 0, 0),
                             pipeline_mode=single)
    mat_spec = pl.BlockSpec((d_m, d_m), lambda b, t: (0, 0),
                            pipeline_mode=single)
    vec_spec = pl.BlockSpec((1, d_m), lambda b, t: (0, 0),
                            pipeline_mode=single)

    return pl.pallas_call(
        kernel,
        out_shape=jax.ShapeDtypeStruct((B, L, d_m), query.dtype),
        grid_spec=pltpu.PrefetchScalarGridSpec(
            num_scalar_prefetch=0,
            grid=(B, n_qt),
            in_specs=[
                q_spec, kv_spec, kv_spec, mask_spec,
                mat_spec, vec_spec,   # Wq, bq
                mat_spec, vec_spec,   # Wk, bk
                mat_spec, vec_spec,   # Wv, bv
                mat_spec, vec_spec,   # Wo, bo
                vec_spec, vec_spec,   # gamma, beta
            ],
            out_specs=q_spec,
            scratch_shapes=[
                pltpu.VMEM((n_head, Lk, d_k), compute_dtype),  # projected K (head-major)
                pltpu.VMEM((n_head, Lk, d_k), compute_dtype),  # projected V (head-major)
                pltpu.VMEM((n_head, tq, d_k), compute_dtype),  # projected Q tile
                pltpu.VMEM((tq, d_m), compute_dtype),          # head-output slab
                pltpu.VMEM((1, Lk), jnp.float32),              # cached mask bias
            ],
        ),
        compiler_params=pltpu.CompilerParams(
            # batch axis is parallel (megacore); the query-tile axis MUST stay
            # 'arbitrary' because the K/V + mask-bias cache carries across it.
            # (If B==1 on a 2-TC part, hoist the K/V projection out and make
            #  the tile axis parallel instead.)
            dimension_semantics=("parallel", "arbitrary"),
            vmem_limit_bytes=_vmem_limit_bytes(L, Lk, d_m, n_head, d_k,
                                               tq, head_chunk)),
    )(query, key, value, mask,
      wq, params["bq"], wk, params["bk"], wv, params["bv"],
      wo, params["bo"], params["gamma"], params["beta"])


def init_params(key, d_m):
    ks = jax.random.split(key, 8)
    scale = 1.0 / math.sqrt(d_m)
    return {
        "wq": jax.random.normal(ks[0], (d_m, d_m), jnp.float32) * scale,
        "bq": jax.random.normal(ks[1], (1, d_m), jnp.float32) * 0.01,
        "wk": jax.random.normal(ks[2], (d_m, d_m), jnp.float32) * scale,
        "bk": jax.random.normal(ks[3], (1, d_m), jnp.float32) * 0.01,
        "wv": jax.random.normal(ks[4], (d_m, d_m), jnp.float32) * scale,
        "bv": jax.random.normal(ks[5], (1, d_m), jnp.float32) * 0.01,
        "wo": jax.random.normal(ks[6], (d_m, d_m), jnp.float32) * scale,
        "bo": jax.random.normal(ks[7], (1, d_m), jnp.float32) * 0.01,
        "gamma": jnp.ones((1, d_m), jnp.float32),
        "beta": jnp.zeros((1, d_m), jnp.float32),
    }


def mha_reference(query, key, value, mask, params, n_head, eps=1e-6):
    """Pure-JAX f32 reference matching the PyTorch module (eval mode)."""
    B, L, d_m = query.shape
    d_k = d_m // n_head
    q = query @ params["wq"] + params["bq"]
    k = key @ params["wk"] + params["bk"]
    v = value @ params["wv"] + params["bv"]
    qh = q.reshape(B, L, n_head, d_k).transpose(0, 2, 1, 3)
    kh = k.reshape(B, -1, n_head, d_k).transpose(0, 2, 1, 3)
    vh = v.reshape(B, -1, n_head, d_k).transpose(0, 2, 1, 3)
    s = jnp.einsum('bhqd,bhkd->bhqk', qh, kh) / math.sqrt(d_k)
    s = s + jnp.where(mask[:, :, None, :] == 0, -1e9, 0.0)
    p = jax.nn.softmax(s, axis=-1)
    ctx = jnp.einsum('bhqk,bhkd->bhqd', p, vh)
    ctx = ctx.transpose(0, 2, 1, 3).reshape(B, L, d_m)
    multi = ctx @ params["wo"] + params["bo"]
    resdl = query + multi
    mu = resdl.mean(-1, keepdims=True)
    var = ((resdl - mu) ** 2).mean(-1, keepdims=True)
    return (resdl - mu) / jnp.sqrt(var + eps) * params["gamma"] + params["beta"]


if __name__ == "__main__":
    B, L, d_m, n_head = 2, 8, 32, 4

    key = jax.random.PRNGKey(0)
    kq, kk, kv, kp = jax.random.split(key, 4)
    query = jax.random.normal(kq, (B, L, d_m), jnp.float32)
    key_in = jax.random.normal(kk, (B, L, d_m), jnp.float32)
    value = jax.random.normal(kv, (B, L, d_m), jnp.float32)

    # mask: [B, 1, L]; zero out last two key positions of the second example.
    mask = jnp.ones((B, 1, L), jnp.float32)
    mask = mask.at[1, 0, L - 2:].set(0.0)

    params = init_params(kp, d_m)
    params_bf16 = prepare_params(params)   # weight casts hoisted out of the call

    out = multi_head_attention(query, key_in, value, mask, params_bf16,
                               n_head=n_head)
    jax.block_until_ready(out)

    assert out.shape == (B, L, d_m)
    assert bool(jnp.isfinite(out).all())

    ref = mha_reference(query, key_in, value, mask, params, n_head)
    max_err = float(jnp.max(jnp.abs(out - ref)))
    # bf16 MXU operands + approx softmax reciprocal => ~1e-2 level drift vs f32.
    assert max_err < 1e-1, f"max abs error vs reference too large: {max_err}"

    print("KERNEL_OK")
</pallas_src>

<mosaic_0001>
module attributes {stable_mosaic.version = 11 : i64} {
  func.func @mha_kernel(%arg0: i32, %arg1: i32, %arg2: memref<1x8x32xf32, #tpu.memory_space<vmem>>, %arg3: memref<1x8x32xbf16, #tpu.memory_space<vmem>>, %arg4: memref<1x8x32xbf16, #tpu.memory_space<vmem>>, %arg5: memref<1x1x8xf32, #tpu.memory_space<vmem>>, %arg6: memref<32x32xbf16, #tpu.memory_space<vmem>>, %arg7: memref<1x32xf32, #tpu.memory_space<vmem>>, %arg8: memref<32x32xbf16, #tpu.memory_space<vmem>>, %arg9: memref<1x32xf32, #tpu.memory_space<vmem>>, %arg10: memref<32x32xbf16, #tpu.memory_space<vmem>>, %arg11: memref<1x32xf32, #tpu.memory_space<vmem>>, %arg12: memref<32x32xbf16, #tpu.memory_space<vmem>>, %arg13: memref<1x32xf32, #tpu.memory_space<vmem>>, %arg14: memref<1x32xf32, #tpu.memory_space<vmem>>, %arg15: memref<1x32xf32, #tpu.memory_space<vmem>>, %arg16: memref<1x8x32xf32, #tpu.memory_space<vmem>>, %arg17: memref<4x8x8xbf16, #tpu.memory_space<vmem>>, %arg18: memref<4x8x8xbf16, #tpu.memory_space<vmem>>, %arg19: memref<4x8x8xbf16, #tpu.memory_space<vmem>>, %arg20: memref<8x32xbf16, #tpu.memory_space<vmem>>, %arg21: memref<1x8xf32, #tpu.memory_space<vmem>>) attributes {dimension_semantics = [#tpu.dimension_semantics<parallel>, #tpu.dimension_semantics<arbitrary>], iteration_bounds = array<i64: 2, 1>, scalar_prefetch = 0 : i64, scratch_operands = 5 : i64, tpu.core_type = #tpu.core_type<tc>, window_params = [{transform_indices = @transform_0, window_bounds = array<i64: 1, 8, 32>}, {transform_indices = @transform_1, window_bounds = array<i64: 1, 8, 32>}, {transform_indices = @transform_2, window_bounds = array<i64: 1, 8, 32>}, {pipeline_mode = #tpu.pipeline_mode<synchronous>, transform_indices = @transform_3, window_bounds = array<i64: 1, 1, 8>}, {pipeline_mode = #tpu.pipeline_mode<synchronous>, transform_indices = @transform_4, window_bounds = array<i64: 32, 32>}, {pipeline_mode = #tpu.pipeline_mode<synchronous>, transform_indices = @transform_5, window_bounds = array<i64: 1, 32>}, {pipeline_mode = #tpu.pipeline_mode<synchronous>, transform_indices = @transform_6, window_bounds = array<i64: 32, 32>}, {pipeline_mode = #tpu.pipeline_mode<synchronous>, transform_indices = @transform_7, window_bounds = array<i64: 1, 32>}, {pipeline_mode = #tpu.pipeline_mode<synchronous>, transform_indices = @transform_8, window_bounds = array<i64: 32, 32>}, {pipeline_mode = #tpu.pipeline_mode<synchronous>, transform_indices = @transform_9, window_bounds = array<i64: 1, 32>}, {pipeline_mode = #tpu.pipeline_mode<synchronous>, transform_indices = @transform_10, window_bounds = array<i64: 32, 32>}, {pipeline_mode = #tpu.pipeline_mode<synchronous>, transform_indices = @transform_11, window_bounds = array<i64: 1, 32>}, {pipeline_mode = #tpu.pipeline_mode<synchronous>, transform_indices = @transform_12, window_bounds = array<i64: 1, 32>}, {pipeline_mode = #tpu.pipeline_mode<synchronous>, transform_indices = @transform_13, window_bounds = array<i64: 1, 32>}, {transform_indices = @transform_14, window_bounds = array<i64: 1, 8, 32>}]} {
    %c0_i32 = arith.constant 0 : i32
    %0 = arith.cmpi eq, %arg1, %c0_i32 : i32
    %1 = arith.extui %0 : i1 to i32
    %c0_i32_0 = arith.constant 0 : i32
    %2 = arith.cmpi ne, %1, %c0_i32_0 : i32
    scf.if %2 {
      %c0_56 = arith.constant 0 : index
      %c0_57 = arith.constant 0 : index
      %c0_58 = arith.constant 0 : index
      %103 = vector.load %arg3[%c0_56, %c0_57, %c0_58] : memref<1x8x32xbf16, #tpu.memory_space<vmem>>, vector<1x8x32xbf16>
      %104 = vector.shape_cast %103 : vector<1x8x32xbf16> to vector<8x32xbf16>
      %c0_59 = arith.constant 0 : index
      %c0_60 = arith.constant 0 : index
      %105 = vector.load %arg8[%c0_59, %c0_60] : memref<32x32xbf16, #tpu.memory_space<vmem>>, vector<32x32xbf16>
      %cst_61 = arith.constant dense<0.000000e+00> : vector<8x32xf32>
      %106 = tpu.matmul %104, %105, %cst_61 {dimension_numbers = #tpu.dot_dimension_numbers<[1], [0], [0], [1], [0, 0, 1, 1], [], []>} : vector<8x32xbf16>, vector<32x32xbf16>, vector<8x32xf32> -> vector<8x32xf32>
      %c0_62 = arith.constant 0 : index
      %c0_63 = arith.constant 0 : index
      %107 = vector.load %arg9[%c0_62, %c0_63] : memref<1x32xf32, #tpu.memory_space<vmem>>, vector<1x32xf32>
      %108 = vector.broadcast %107 : vector<1x32xf32> to vector<8x32xf32>
      %109 = arith.addf %106, %108 : vector<8x32xf32>
      %c0_64 = arith.constant 0 : index
      %c0_65 = arith.constant 0 : index
      %c0_66 = arith.constant 0 : index
      %110 = vector.load %arg4[%c0_64, %c0_65, %c0_66] : memref<1x8x32xbf16, #tpu.memory_space<vmem>>, vector<1x8x32xbf16>
      %111 = vector.shape_cast %110 : vector<1x8x32xbf16> to vector<8x32xbf16>
      %c0_67 = arith.constant 0 : index
      %c0_68 = arith.constant 0 : index
      %112 = vector.load %arg10[%c0_67, %c0_68] : memref<32x32xbf16, #tpu.memory_space<vmem>>, vector<32x32xbf16>
      %cst_69 = arith.constant dense<0.000000e+00> : vector<8x32xf32>
      %113 = tpu.matmul %111, %112, %cst_69 {dimension_numbers = #tpu.dot_dimension_numbers<[1], [0], [0], [1], [0, 0, 1, 1], [], []>} : vector<8x32xbf16>, vector<32x32xbf16>, vector<8x32xf32> -> vector<8x32xf32>
      %c0_70 = arith.constant 0 : index
      %c0_71 = arith.constant 0 : index
      %114 = vector.load %arg11[%c0_70, %c0_71] : memref<1x32xf32, #tpu.memory_space<vmem>>, vector<1x32xf32>
      %115 = vector.broadcast %114 : vector<1x32xf32> to vector<8x32xf32>
      %116 = arith.addf %113, %115 : vector<8x32xf32>
      %117 = vector.extract_strided_slice %109 {offsets = [0, 0], sizes = [8, 8], strides = [1, 1]} : vector<8x32xf32> to vector<8x8xf32>
      %118 = arith.truncf %117 : vector<8x8xf32> to vector<8x8xbf16>
      %c0_72 = arith.constant 0 : index
      %c0_73 = arith.constant 0 : index
      %c0_74 = arith.constant 0 : index
      %119 = vector.load %arg17[%c0_72, %c0_73, %c0_74] : memref<4x8x8xbf16, #tpu.memory_space<vmem>>, vector<1x8x8xbf16>
      %120 = vector.shape_cast %119 : vector<1x8x8xbf16> to vector<8x8xbf16>
      %121 = vector.shape_cast %118 : vector<8x8xbf16> to vector<1x8x8xbf16>
      tpu.vector_store %arg17[%c0_72, %c0_73, %c0_74], %121 {strides = array<i32>} : memref<4x8x8xbf16, #tpu.memory_space<vmem>>, vector<1x8x8xbf16>,
      %122 = vector.extract_strided_slice %116 {offsets = [0, 0], sizes = [8, 8], strides = [1, 1]} : vector<8x32xf32> to vector<8x8xf32>
      %123 = arith.truncf %122 : vector<8x8xf32> to vector<8x8xbf16>
      %c0_75 = arith.constant 0 : index
      %c0_76 = arith.constant 0 : index
      %c0_77 = arith.constant 0 : index
      %124 = vector.load %arg18[%c0_75, %c0_76, %c0_77] : memref<4x8x8xbf16, #tpu.memory_space<vmem>>, vector<1x8x8xbf16>
      %125 = vector.shape_cast %124 : vector<1x8x8xbf16> to vector<8x8xbf16>
      %126 = vector.shape_cast %123 : vector<8x8xbf16> to vector<1x8x8xbf16>
      tpu.vector_store %arg18[%c0_75, %c0_76, %c0_77], %126 {strides = array<i32>} : memref<4x8x8xbf16, #tpu.memory_space<vmem>>, vector<1x8x8xbf16>,
      %127 = vector.extract_strided_slice %109 {offsets = [0, 8], sizes = [8, 8], strides = [1, 1]} : vector<8x32xf32> to vector<8x8xf32>
      %128 = arith.truncf %127 : vector<8x8xf32> to vector<8x8xbf16>
      %c1_78 = arith.constant 1 : index
      %c0_79 = arith.constant 0 : index
      %c0_80 = arith.constant 0 : index
      %129 = vector.load %arg17[%c1_78, %c0_79, %c0_80] : memref<4x8x8xbf16, #tpu.memory_space<vmem>>, vector<1x8x8xbf16>
      %130 = vector.shape_cast %129 : vector<1x8x8xbf16> to vector<8x8xbf16>
      %131 = vector.shape_cast %128 : vector<8x8xbf16> to vector<1x8x8xbf16>
      tpu.vector_store %arg17[%c1_78, %c0_79, %c0_80], %131 {strides = array<i32>} : memref<4x8x8xbf16, #tpu.memory_space<vmem>>, vector<1x8x8xbf16>,
      %132 = vector.extract_strided_slice %116 {offsets = [0, 8], sizes = [8, 8], strides = [1, 1]} : vector<8x32xf32> to vector<8x8xf32>
      %133 = arith.truncf %132 : vector<8x8xf32> to vector<8x8xbf16>
      %c1_81 = arith.constant 1 : index
      %c0_82 = arith.constant 0 : index
      %c0_83 = arith.constant 0 : index
      %134 = vector.load %arg18[%c1_81, %c0_82, %c0_83] : memref<4x8x8xbf16, #tpu.memory_space<vmem>>, vector<1x8x8xbf16>
      %135 = vector.shape_cast %134 : vector<1x8x8xbf16> to vector<8x8xbf16>
      %136 = vector.shape_cast %133 : vector<8x8xbf16> to vector<1x8x8xbf16>
      tpu.vector_store %arg18[%c1_81, %c0_82, %c0_83], %136 {strides = array<i32>} : memref<4x8x8xbf16, #tpu.memory_space<vmem>>, vector<1x8x8xbf16>,
      %137 = vector.extract_strided_slice %109 {offsets = [0, 16], sizes = [8, 8], strides = [1, 1]} : vector<8x32xf32> to vector<8x8xf32>
      %138 = arith.truncf %137 : vector<8x8xf32> to vector<8x8xbf16>
      %c2_84 = arith.constant 2 : index
      %c0_85 = arith.constant 0 : index
      %c0_86 = arith.constant 0 : index
      %139 = vector.load %arg17[%c2_84, %c0_85, %c0_86] : memref<4x8x8xbf16, #tpu.memory_space<vmem>>, vector<1x8x8xbf16>
      %140 = vector.shape_cast %139 : vector<1x8x8xbf16> to vector<8x8xbf16>
      %141 = vector.shape_cast %138 : vector<8x8xbf16> to vector<1x8x8xbf16>
      tpu.vector_store %arg17[%c2_84, %c0_85, %c0_86], %141 {strides = array<i32>} : memref<4x8x8xbf16, #tpu.memory_space<vmem>>, vector<1x8x8xbf16>,
      %142 = vector.extract_strided_slice %116 {offsets = [0, 16], sizes = [8, 8], strides = [1, 1]} : vector<8x32xf32> to vector<8x8xf32>
      %143 = arith.truncf %142 : vector<8x8xf32> to vector<8x8xbf16>
      %c2_87 = arith.constant 2 : index
      %c0_88 = arith.constant 0 : index
      %c0_89 = arith.constant 0 : index
      %144 = vector.load %arg18[%c2_87, %c0_88, %c0_89] : memref<4x8x8xbf16, #tpu.memory_space<vmem>>, vector<1x8x8xbf16>
      %145 = vector.shape_cast %144 : vector<1x8x8xbf16> to vector<8x8xbf16>
      %146 = vector.shape_cast %143 : vector<8x8xbf16> to vector<1x8x8xbf16>
      tpu.vector_store %arg18[%c2_87, %c0_88, %c0_89], %146 {strides = array<i32>} : memref<4x8x8xbf16, #tpu.memory_space<vmem>>, vector<1x8x8xbf16>,
      %147 = vector.extract_strided_slice %109 {offsets = [0, 24], sizes = [8, 8], strides = [1, 1]} : vector<8x32xf32> to vector<8x8xf32>
      %148 = arith.truncf %147 : vector<8x8xf32> to vector<8x8xbf16>
      %c3_90 = arith.constant 3 : index
      %c0_91 = arith.constant 0 : index
      %c0_92 = arith.constant 0 : index
      %149 = vector.load %arg17[%c3_90, %c0_91, %c0_92] : memref<4x8x8xbf16, #tpu.memory_space<vmem>>, vector<1x8x8xbf16>
      %150 = vector.shape_cast %149 : vector<1x8x8xbf16> to vector<8x8xbf16>
      %151 = vector.shape_cast %148 : vector<8x8xbf16> to vector<1x8x8xbf16>
      tpu.vector_store %arg17[%c3_90, %c0_91, %c0_92], %151 {strides = array<i32>} : memref<4x8x8xbf16, #tpu.memory_space<vmem>>, vector<1x8x8xbf16>,
      %152 = vector.extract_strided_slice %116 {offsets = [0, 24], sizes = [8, 8], strides = [1, 1]} : vector<8x32xf32> to vector<8x8xf32>
      %153 = arith.truncf %152 : vector<8x8xf32> to vector<8x8xbf16>
      %c3_93 = arith.constant 3 : index
      %c0_94 = arith.constant 0 : index
      %c0_95 = arith.constant 0 : index
      %154 = vector.load %arg18[%c3_93, %c0_94, %c0_95] : memref<4x8x8xbf16, #tpu.memory_space<vmem>>, vector<1x8x8xbf16>
      %155 = vector.shape_cast %154 : vector<1x8x8xbf16> to vector<8x8xbf16>
      %156 = vector.shape_cast %153 : vector<8x8xbf16> to vector<1x8x8xbf16>
      tpu.vector_store %arg18[%c3_93, %c0_94, %c0_95], %156 {strides = array<i32>} : memref<4x8x8xbf16, #tpu.memory_space<vmem>>, vector<1x8x8xbf16>,
      %c0_96 = arith.constant 0 : index
      %c0_97 = arith.constant 0 : index
      %c0_98 = arith.constant 0 : index
      %157 = vector.load %arg5[%c0_96, %c0_97, %c0_98] : memref<1x1x8xf32, #tpu.memory_space<vmem>>, vector<1x1x8xf32>
      %158 = vector.shape_cast %157 : vector<1x1x8xf32> to vector<1x8xf32>
      %cst_99 = arith.constant 0.000000e+00 : f32
      %159 = vector.broadcast %cst_99 : f32 to vector<1x8xf32>
      %160 = arith.cmpf oeq, %158, %159 : vector<1x8xf32>
      %cst_100 = arith.constant -1.000000e+09 : f32
      %cst_101 = arith.constant 0.000000e+00 : f32
      %161 = vector.broadcast %cst_100 : f32 to vector<1x8xf32>
      %162 = vector.broadcast %cst_101 : f32 to vector<1x8xf32>
      %163 = arith.select %160, %161, %162 : vector<1x8xi1>, vector<1x8xf32>
      %c0_102 = arith.constant 0 : index
      %c0_103 = arith.constant 0 : index
      %164 = vector.load %arg21[%c0_102, %c0_103] : memref<1x8xf32, #tpu.memory_space<vmem>>, vector<1x8xf32>
      tpu.vector_store %arg21[%c0_102, %c0_103], %163 {strides = array<i32>} : memref<1x8xf32, #tpu.memory_space<vmem>>, vector<1x8xf32>,
    } else {
    }
    %c0 = arith.constant 0 : index
    %c0_1 = arith.constant 0 : index
    %c0_2 = arith.constant 0 : index
    %3 = vector.load %arg2[%c0, %c0_1, %c0_2] : memref<1x8x32xf32, #tpu.memory_space<vmem>>, vector<1x8x32xf32>
    %4 = vector.shape_cast %3 : vector<1x8x32xf32> to vector<8x32xf32>
    %5 = arith.truncf %4 : vector<8x32xf32> to vector<8x32xbf16>
    %c0_3 = arith.constant 0 : index
    %c0_4 = arith.constant 0 : index
    %6 = vector.load %arg6[%c0_3, %c0_4] : memref<32x32xbf16, #tpu.memory_space<vmem>>, vector<32x32xbf16>
    %cst = arith.constant dense<0.000000e+00> : vector<8x32xf32>
    %7 = tpu.matmul %5, %6, %cst {dimension_numbers = #tpu.dot_dimension_numbers<[1], [0], [0], [1], [0, 0, 1, 1], [], []>} : vector<8x32xbf16>, vector<32x32xbf16>, vector<8x32xf32> -> vector<8x32xf32>
    %c0_5 = arith.constant 0 : index
    %c0_6 = arith.constant 0 : index
    %8 = vector.load %arg7[%c0_5, %c0_6] : memref<1x32xf32, #tpu.memory_space<vmem>>, vector<1x32xf32>
    %9 = vector.broadcast %8 : vector<1x32xf32> to vector<8x32xf32>
    %10 = arith.addf %7, %9 : vector<8x32xf32>
    %cst_7 = arith.constant 0.353553385 : f32
    %11 = vector.broadcast %cst_7 : f32 to vector<8x32xf32>
    %12 = arith.mulf %10, %11 : vector<8x32xf32>
    %13 = vector.extract_strided_slice %12 {offsets = [0, 0], sizes = [8, 8], strides = [1, 1]} : vector<8x32xf32> to vector<8x8xf32>
    %14 = arith.truncf %13 : vector<8x8xf32> to vector<8x8xbf16>
    %c0_8 = arith.constant 0 : index
    %c0_9 = arith.constant 0 : index
    %c0_10 = arith.constant 0 : index
    %15 = vector.load %arg19[%c0_8, %c0_9, %c0_10] : memref<4x8x8xbf16, #tpu.memory_space<vmem>>, vector<1x8x8xbf16>
    %16 = vector.shape_cast %15 : vector<1x8x8xbf16> to vector<8x8xbf16>
    %17 = vector.shape_cast %14 : vector<8x8xbf16> to vector<1x8x8xbf16>
    tpu.vector_store %arg19[%c0_8, %c0_9, %c0_10], %17 {strides = array<i32>} : memref<4x8x8xbf16, #tpu.memory_space<vmem>>, vector<1x8x8xbf16>,
    %18 = vector.extract_strided_slice %12 {offsets = [0, 8], sizes = [8, 8], strides = [1, 1]} : vector<8x32xf32> to vector<8x8xf32>
    %19 = arith.truncf %18 : vector<8x8xf32> to vector<8x8xbf16>
    %c1 = arith.constant 1 : index
    %c0_11 = arith.constant 0 : index
    %c0_12 = arith.constant 0 : index
    %20 = vector.load %arg19[%c1, %c0_11, %c0_12] : memref<4x8x8xbf16, #tpu.memory_space<vmem>>, vector<1x8x8xbf16>
    %21 = vector.shape_cast %20 : vector<1x8x8xbf16> to vector<8x8xbf16>
    %22 = vector.shape_cast %19 : vector<8x8xbf16> to vector<1x8x8xbf16>
    tpu.vector_store %arg19[%c1, %c0_11, %c0_12], %22 {strides = array<i32>} : memref<4x8x8xbf16, #tpu.memory_space<vmem>>, vector<1x8x8xbf16>,
    %23 = vector.extract_strided_slice %12 {offsets = [0, 16], sizes = [8, 8], strides = [1, 1]} : vector<8x32xf32> to vector<8x8xf32>
    %24 = arith.truncf %23 : vector<8x8xf32> to vector<8x8xbf16>
    %c2 = arith.constant 2 : index
    %c0_13 = arith.constant 0 : index
    %c0_14 = arith.constant 0 : index
    %25 = vector.load %arg19[%c2, %c0_13, %c0_14] : memref<4x8x8xbf16, #tpu.memory_space<vmem>>, vector<1x8x8xbf16>
    %26 = vector.shape_cast %25 : vector<1x8x8xbf16> to vector<8x8xbf16>
    %27 = vector.shape_cast %24 : vector<8x8xbf16> to vector<1x8x8xbf16>
    tpu.vector_store %arg19[%c2, %c0_13, %c0_14], %27 {strides = array<i32>} : memref<4x8x8xbf16, #tpu.memory_space<vmem>>, vector<1x8x8xbf16>,
    %28 = vector.extract_strided_slice %12 {offsets = [0, 24], sizes = [8, 8], strides = [1, 1]} : vector<8x32xf32> to vector<8x8xf32>
    %29 = arith.truncf %28 : vector<8x8xf32> to vector<8x8xbf16>
    %c3 = arith.constant 3 : index
    %c0_15 = arith.constant 0 : index
    %c0_16 = arith.constant 0 : index
    %30 = vector.load %arg19[%c3, %c0_15, %c0_16] : memref<4x8x8xbf16, #tpu.memory_space<vmem>>, vector<1x8x8xbf16>
    %31 = vector.shape_cast %30 : vector<1x8x8xbf16> to vector<8x8xbf16>
    %32 = vector.shape_cast %29 : vector<8x8xbf16> to vector<1x8x8xbf16>
    tpu.vector_store %arg19[%c3, %c0_15, %c0_16], %32 {strides = array<i32>} : memref<4x8x8xbf16, #tpu.memory_space<vmem>>, vector<1x8x8xbf16>,
    %c0_17 = arith.constant 0 : index
    %c0_18 = arith.constant 0 : index
    %33 = vector.load %arg21[%c0_17, %c0_18] : memref<1x8xf32, #tpu.memory_space<vmem>>, vector<1x8xf32>
    %c0_19 = arith.constant 0 : index
    %c0_20 = arith.constant 0 : index
    %c0_21 = arith.constant 0 : index
    %34 = vector.load %arg19[%c0_19, %c0_20, %c0_21] : memref<4x8x8xbf16, #tpu.memory_space<vmem>>, vector<4x8x8xbf16>
    %c0_22 = arith.constant 0 : index
    %c0_23 = arith.constant 0 : index
    %c0_24 = arith.constant 0 : index
    %35 = vector.load %arg17[%c0_22, %c0_23, %c0_24] : memref<4x8x8xbf16, #tpu.memory_space<vmem>>, vector<4x8x8xbf16>
    %c0_25 = arith.constant 0 : index
    %c0_26 = arith.constant 0 : index
    %c0_27 = arith.constant 0 : index
    %36 = vector.load %arg18[%c0_25, %c0_26, %c0_27] : memref<4x8x8xbf16, #tpu.memory_space<vmem>>, vector<4x8x8xbf16>
    "tpu.trace_start"() <{level = 10 : i32, message = "hqd,hkd->hqk"}> : () -> ()
    %cst_28 = arith.constant dense<0.000000e+00> : vector<4x8x8xf32>
    %37 = tpu.matmul %34, %35, %cst_28 {dimension_numbers = #tpu.dot_dimension_numbers<[2], [2], [1], [1], [0, 0, 0, 1, 1, 1], [0], [0]>} : vector<4x8x8xbf16>, vector<4x8x8xbf16>, vector<4x8x8xf32> -> vector<4x8x8xf32>
    "tpu.trace_stop"() : () -> ()
    %38 = vector.shape_cast %33 : vector<1x8xf32> to vector<1x1x8xf32>
    %39 = vector.broadcast %38 : vector<1x1x8xf32> to vector<4x8x8xf32>
    %40 = arith.addf %37, %39 : vector<4x8x8xf32>
    %cst_29 = arith.constant dense<0xFF800000> : vector<4x8xf32>
    %41 = vector.multi_reduction <maximumf>, %40, %cst_29 [2] : vector<4x8x8xf32> to vector<4x8xf32>
    %42 = vector.shape_cast %41 : vector<4x8xf32> to vector<4x8x1xf32>
    %43 = vector.broadcast %42 : vector<4x8x1xf32> to vector<4x8x8xf32>
    %44 = arith.subf %40, %43 : vector<4x8x8xf32>
    %45 = math.exp %44 : vector<4x8x8xf32>
    %cst_30 = arith.constant dense<0.000000e+00> : vector<4x8xf32>
    %46 = vector.multi_reduction <add>, %45, %cst_30 [2] : vector<4x8x8xf32> to vector<4x8xf32>
    %47 = vector.shape_cast %46 : vector<4x8xf32> to vector<4x8x1xf32>
    %48 = tpu.reciprocal %47 {approx = true} : vector<4x8x1xf32> -> vector<4x8x1xf32>
    %49 = vector.broadcast %48 : vector<4x8x1xf32> to vector<4x8x8xf32>
    %50 = arith.mulf %45, %49 : vector<4x8x8xf32>
    %51 = arith.truncf %50 : vector<4x8x8xf32> to vector<4x8x8xbf16>
    "tpu.trace_start"() <{level = 10 : i32, message = "hqk,hkd->hqd"}> : () -> ()
    %cst_31 = arith.constant dense<0.000000e+00> : vector<4x8x8xf32>
    %52 = tpu.matmul %51, %36, %cst_31 {dimension_numbers = #tpu.dot_dimension_numbers<[2], [1], [1], [2], [0, 0, 0, 1, 1, 2], [0], [0]>} : vector<4x8x8xbf16>, vector<4x8x8xbf16>, vector<4x8x8xf32> -> vector<4x8x8xf32>
    "tpu.trace_stop"() : () -> ()
    %53 = vector.extract_strided_slice %52 {offsets = [0, 0, 0], sizes = [1, 8, 8], strides = [1, 1, 1]} : vector<4x8x8xf32> to vector<1x8x8xf32>
    %54 = vector.shape_cast %53 : vector<1x8x8xf32> to vector<8x8xf32>
    %55 = arith.truncf %54 : vector<8x8xf32> to vector<8x8xbf16>
    %c0_32 = arith.constant 0 : index
    %c0_33 = arith.constant 0 : index
    %56 = vector.load %arg20[%c0_32, %c0_33] : memref<8x32xbf16, #tpu.memory_space<vmem>>, vector<8x8xbf16>
    tpu.vector_store %arg20[%c0_32, %c0_33], %55 {strides = array<i32>} : memref<8x32xbf16, #tpu.memory_space<vmem>>, vector<8x8xbf16>,
    %57 = vector.extract_strided_slice %52 {offsets = [1, 0, 0], sizes = [1, 8, 8], strides = [1, 1, 1]} : vector<4x8x8xf32> to vector<1x8x8xf32>
    %58 = vector.shape_cast %57 : vector<1x8x8xf32> to vector<8x8xf32>
    %59 = arith.truncf %58 : vector<8x8xf32> to vector<8x8xbf16>
    %c0_34 = arith.constant 0 : index
    %c8 = arith.constant 8 : index
    %60 = vector.load %arg20[%c0_34, %c8] : memref<8x32xbf16, #tpu.memory_space<vmem>>, vector<8x8xbf16>
    tpu.vector_store %arg20[%c0_34, %c8], %59 {strides = array<i32>} : memref<8x32xbf16, #tpu.memory_space<vmem>>, vector<8x8xbf16>,
    %61 = vector.extract_strided_slice %52 {offsets = [2, 0, 0], sizes = [1, 8, 8], strides = [1, 1, 1]} : vector<4x8x8xf32> to vector<1x8x8xf32>
    %62 = vector.shape_cast %61 : vector<1x8x8xf32> to vector<8x8xf32>
    %63 = arith.truncf %62 : vector<8x8xf32> to vector<8x8xbf16>
    %c0_35 = arith.constant 0 : index
    %c16 = arith.constant 16 : index
    %64 = vector.load %arg20[%c0_35, %c16] : memref<8x32xbf16, #tpu.memory_space<vmem>>, vector<8x8xbf16>
    tpu.vector_store %arg20[%c0_35, %c16], %63 {strides = array<i32>} : memref<8x32xbf16, #tpu.memory_space<vmem>>, vector<8x8xbf16>,
    %65 = vector.extract_strided_slice %52 {offsets = [3, 0, 0], sizes = [1, 8, 8], strides = [1, 1, 1]} : vector<4x8x8xf32> to vector<1x8x8xf32>
    %66 = vector.shape_cast %65 : vector<1x8x8xf32> to vector<8x8xf32>
    %67 = arith.truncf %66 : vector<8x8xf32> to vector<8x8xbf16>
    %c0_36 = arith.constant 0 : index
    %c24 = arith.constant 24 : index
    %68 = vector.load %arg20[%c0_36, %c24] : memref<8x32xbf16, #tpu.memory_space<vmem>>, vector<8x8xbf16>
    tpu.vector_store %arg20[%c0_36, %c24], %67 {strides = array<i32>} : memref<8x32xbf16, #tpu.memory_space<vmem>>, vector<8x8xbf16>,
    %c0_37 = arith.constant 0 : index
    %c0_38 = arith.constant 0 : index
    %69 = vector.load %arg20[%c0_37, %c0_38] : memref<8x32xbf16, #tpu.memory_space<vmem>>, vector<8x32xbf16>
    %c0_39 = arith.constant 0 : index
    %c0_40 = arith.constant 0 : index
    %70 = vector.load %arg12[%c0_39, %c0_40] : memref<32x32xbf16, #tpu.memory_space<vmem>>, vector<32x32xbf16>
    %cst_41 = arith.constant dense<0.000000e+00> : vector<8x32xf32>
    %71 = tpu.matmul %69, %70, %cst_41 {dimension_numbers = #tpu.dot_dimension_numbers<[1], [0], [0], [1], [0, 0, 1, 1], [], []>} : vector<8x32xbf16>, vector<32x32xbf16>, vector<8x32xf32> -> vector<8x32xf32>
    %c0_42 = arith.constant 0 : index
    %c0_43 = arith.constant 0 : index
    %72 = vector.load %arg13[%c0_42, %c0_43] : memref<1x32xf32, #tpu.memory_space<vmem>>, vector<1x32xf32>
    %73 = vector.broadcast %72 : vector<1x32xf32> to vector<8x32xf32>
    %74 = arith.addf %71, %73 : vector<8x32xf32>
    %75 = arith.addf %4, %74 : vector<8x32xf32>
    %cst_44 = arith.constant dense<0.000000e+00> : vector<8xf32>
    %76 = vector.multi_reduction <add>, %75, %cst_44 [1] : vector<8x32xf32> to vector<8xf32>
    %77 = vector.shape_cast %76 : vector<8xf32> to vector<8x1xf32>
    %cst_45 = arith.constant 3.200000e+01 : f32
    %78 = vector.broadcast %cst_45 : f32 to vector<8x1xf32>
    %79 = arith.divf %77, %78 : vector<8x1xf32>
    %80 = vector.broadcast %79 : vector<8x1xf32> to vector<8x32xf32>
    %81 = arith.subf %75, %80 : vector<8x32xf32>
    %82 = arith.mulf %81, %81 : vector<8x32xf32>
    %cst_46 = arith.constant dense<0.000000e+00> : vector<8xf32>
    %83 = vector.multi_reduction <add>, %82, %cst_46 [1] : vector<8x32xf32> to vector<8xf32>
    %84 = vector.shape_cast %83 : vector<8xf32> to vector<8x1xf32>
    %cst_47 = arith.constant 3.200000e+01 : f32
    %85 = vector.broadcast %cst_47 : f32 to vector<8x1xf32>
    %86 = arith.divf %84, %85 : vector<8x1xf32>
    %87 = vector.broadcast %79 : vector<8x1xf32> to vector<8x32xf32>
    %88 = arith.subf %75, %87 : vector<8x32xf32>
    %cst_48 = arith.constant 9.99999997E-7 : f32
    %89 = vector.broadcast %cst_48 : f32 to vector<8x1xf32>
    %90 = arith.addf %86, %89 : vector<8x1xf32>
    %91 = math.rsqrt %90 : vector<8x1xf32>
    %92 = vector.broadcast %91 : vector<8x1xf32> to vector<8x32xf32>
    %93 = arith.mulf %88, %92 : vector<8x32xf32>
    %c0_49 = arith.constant 0 : index
    %c0_50 = arith.constant 0 : index
    %94 = vector.load %arg14[%c0_49, %c0_50] : memref<1x32xf32, #tpu.memory_space<vmem>>, vector<1x32xf32>
    %95 = vector.broadcast %94 : vector<1x32xf32> to vector<8x32xf32>
    %96 = arith.mulf %93, %95 : vector<8x32xf32>
    %c0_51 = arith.constant 0 : index
    %c0_52 = arith.constant 0 : index
    %97 = vector.load %arg15[%c0_51, %c0_52] : memref<1x32xf32, #tpu.memory_space<vmem>>, vector<1x32xf32>
    %98 = vector.broadcast %97 : vector<1x32xf32> to vector<8x32xf32>
    %99 = arith.addf %96, %98 : vector<8x32xf32>
    %c0_53 = arith.constant 0 : index
    %c0_54 = arith.constant 0 : index
    %c0_55 = arith.constant 0 : index
    %100 = vector.load %arg16[%c0_53, %c0_54, %c0_55] : memref<1x8x32xf32, #tpu.memory_space<vmem>>, vector<1x8x32xf32>
    %101 = vector.shape_cast %100 : vector<1x8x32xf32> to vector<8x32xf32>
    %102 = vector.shape_cast %99 : vector<8x32xf32> to vector<1x8x32xf32>
    tpu.vector_store %arg16[%c0_53, %c0_54, %c0_55], %102 {strides = array<i32>} : memref<1x8x32xf32, #tpu.memory_space<vmem>>, vector<1x8x32xf32>,
    return
  }
  func.func @transform_0(%arg0: i32, %arg1: i32) -> (i32, i32, i32) {
    %c0_i32 = arith.constant 0 : i32
    %c0_i32_0 = arith.constant 0 : i32
    return %arg0, %arg1, %c0_i32 : i32, i32, i32
  }
  func.func @transform_1(%arg0: i32, %arg1: i32) -> (i32, i32, i32) {
    %c0_i32 = arith.constant 0 : i32
    %c0_i32_0 = arith.constant 0 : i32
    %c0_i32_1 = arith.constant 0 : i32
    return %arg0, %c0_i32, %c0_i32_0 : i32, i32, i32
  }
  func.func @transform_2(%arg0: i32, %arg1: i32) -> (i32, i32, i32) {
    %c0_i32 = arith.constant 0 : i32
    %c0_i32_0 = arith.constant 0 : i32
    %c0_i32_1 = arith.constant 0 : i32
    return %arg0, %c0_i32, %c0_i32_0 : i32, i32, i32
  }
  func.func @transform_3(%arg0: i32, %arg1: i32) -> (i32, i32, i32) {
    %c0_i32 = arith.constant 0 : i32
    %c0_i32_0 = arith.constant 0 : i32
    %c0_i32_1 = arith.constant 0 : i32
    return %arg0, %c0_i32, %c0_i32_0 : i32, i32, i32
  }
  func.func @transform_4(%arg0: i32, %arg1: i32) -> (i32, i32) {
    %c0_i32 = arith.constant 0 : i32
    %c0_i32_0 = arith.constant 0 : i32
    %c0_i32_1 = arith.constant 0 : i32
    return %c0_i32, %c0_i32_0 : i32, i32
  }
  func.func @transform_5(%arg0: i32, %arg1: i32) -> (i32, i32) {
    %c0_i32 = arith.constant 0 : i32
    %c0_i32_0 = arith.constant 0 : i32
    %c0_i32_1 = arith.constant 0 : i32
    return %c0_i32, %c0_i32_0 : i32, i32
  }
  func.func @transform_6(%arg0: i32, %arg1: i32) -> (i32, i32) {
    %c0_i32 = arith.constant 0 : i32
    %c0_i32_0 = arith.constant 0 : i32
    %c0_i32_1 = arith.constant 0 : i32
    return %c0_i32, %c0_i32_0 : i32, i32
  }
  func.func @transform_7(%arg0: i32, %arg1: i32) -> (i32, i32) {
    %c0_i32 = arith.constant 0 : i32
    %c0_i32_0 = arith.constant 0 : i32
    %c0_i32_1 = arith.constant 0 : i32
    return %c0_i32, %c0_i32_0 : i32, i32
  }
  func.func @transform_8(%arg0: i32, %arg1: i32) -> (i32, i32) {
    %c0_i32 = arith.constant 0 : i32
    %c0_i32_0 = arith.constant 0 : i32
    %c0_i32_1 = arith.constant 0 : i32
    return %c0_i32, %c0_i32_0 : i32, i32
  }
  func.func @transform_9(%arg0: i32, %arg1: i32) -> (i32, i32) {
    %c0_i32 = arith.constant 0 : i32
    %c0_i32_0 = arith.constant 0 : i32
    %c0_i32_1 = arith.constant 0 : i32
    return %c0_i32, %c0_i32_0 : i32, i32
  }
  func.func @transform_10(%arg0: i32, %arg1: i32) -> (i32, i32) {
    %c0_i32 = arith.constant 0 : i32
    %c0_i32_0 = arith.constant 0 : i32
    %c0_i32_1 = arith.constant 0 : i32
    return %c0_i32, %c0_i32_0 : i32, i32
  }
  func.func @transform_11(%arg0: i32, %arg1: i32) -> (i32, i32) {
    %c0_i32 = arith.constant 0 : i32
    %c0_i32_0 = arith.constant 0 : i32
    %c0_i32_1 = arith.constant 0 : i32
    return %c0_i32, %c0_i32_0 : i32, i32
  }
  func.func @transform_12(%arg0: i32, %arg1: i32) -> (i32, i32) {
    %c0_i32 = arith.constant 0 : i32
    %c0_i32_0 = arith.constant 0 : i32
    %c0_i32_1 = arith.constant 0 : i32
    return %c0_i32, %c0_i32_0 : i32, i32
  }
  func.func @transform_13(%arg0: i32, %arg1: i32) -> (i32, i32) {
    %c0_i32 = arith.constant 0 : i32
    %c0_i32_0 = arith.constant 0 : i32
    %c0_i32_1 = arith.constant 0 : i32
    return %c0_i32, %c0_i32_0 : i32, i32
  }
  func.func @transform_14(%arg0: i32, %arg1: i32) -> (i32, i32, i32) {
    %c0_i32 = arith.constant 0 : i32
    %c0_i32_0 = arith.constant 0 : i32
    return %arg0, %arg1, %c0_i32 : i32, i32, i32
  }
}

</mosaic_0001>

<bundles_post_ra>
// kernel: tpu_custom_call.1
= control target key start
LH: loop header
LB: loop body
LE: loop exit
PB: predicated region body
PF: predicated region fallthrough
CT: control target
= control target key end

     0   :  { %s2282_s0 = inlined_call_operand.hbm [shape: f32[2,8,32], index: 0, kind: input, shape index: {}]   ;;  %s2283_s1 = inlined_call_operand.hbm [shape: bf16[2,8,32], index: 1, kind: input, shape index: {}]   ;;  %s2284_s2 = inlined_call_operand.hbm [shape: bf16[2,8,32], index: 2, kind: input, shape index: {}]   ;;  %s2285_s3 = inlined_call_operand.vmem [shape: f32[2,1,8], index: 3, kind: input, shape index: {}]   ;;  %s2286_s4 = inlined_call_operand.hbm [shape: bf16[32,32], index: 4, kind: input, shape index: {}]   ;;  %s2287_s5 = inlined_call_operand.vmem [shape: f32[1,32], index: 5, kind: input, shape index: {}]   ;;  %s2288_s6 = inlined_call_operand.hbm [shape: bf16[32,32], index: 6, kind: input, shape index: {}]   ;;  %s2289_s7 = inlined_call_operand.vmem [shape: f32[1,32], index: 7, kind: input, shape index: {}]   ;;  %s2290_s8 = inlined_call_operand.hbm [shape: bf16[32,32], index: 8, kind: input, shape index: {}]   ;;  %s2291_s9 = inlined_call_operand.vmem [shape: f32[1,32], index: 9, kind: input, shape index: {}]   ;;  %s2292_s10 = inlined_call_operand.hbm [shape: bf16[32,32], index: 10, kind: input, shape index: {}]   ;;  %s2293_s11 = inlined_call_operand.vmem [shape: f32[1,32], index: 11, kind: input, shape index: {}]   ;;  %s2294_s12 = inlined_call_operand.vmem [shape: f32[1,32], index: 12, kind: input, shape index: {}]   ;;  %s2295_s13 = inlined_call_operand.vmem [shape: f32[1,32], index: 13, kind: input, shape index: {}]   ;;  %s2296_s14 = inlined_call_operand.hbm [shape: f32[2,8,32], index: 14, kind: output, shape index: {}]  }
   0x1   :  { %2311 = sst [smem:[#allocation32_spill]] %s2283_s1 }
   0x2   :  { %2312 = sst [smem:[#allocation33_spill]] %s2284_s2 }
   0x3   :  { %2313 = sst [smem:[#allocation34_spill]] %s2285_s3 }
   0x4   :  { %2314 = sst [smem:[#allocation35_spill]] %s2286_s4 }
   0x5   :  { %2315 = sst [smem:[#allocation36_spill]] %s2288_s6 }
   0x6   :  { %2316 = sst [smem:[#allocation37_spill]] %s2290_s8 }
   0x7   :  { %2317 = sst [smem:[#allocation38_spill]] %s2291_s9 }
   0x8   :  { %2318 = sst [smem:[#allocation39_spill]] %s2293_s11 }
   0x9   :  { %2319 = sst [smem:[#allocation40_spill]] %s2294_s12 }
   0xa   :  { %2320 = sst [smem:[#allocation41_spill]] %s2295_s13 }
   0xb   :  { %2321 = sst [smem:[#allocation42_spill]] %s2296_s14 }
   0xc   :  { %19 = vsyncpa [#allocation8], 0 }
   0xd   :  { %21 = vsyncpa [#allocation8 + $0x1], 0 }
   0xe   :  { %22 = vsyncpa [#allocation11], 0 }
   0xf   :  { %24 = vsyncpa [#allocation11 + $0x1], 0 }
  0x10   :  { %25 = vsyncpa [#allocation14], 0 }
  0x11   :  { %26 = vsyncpa [#allocation17], 0 }
  0x12   :  { %27 = vsyncpa [#allocation9], 0 }
  0x13   :  { %29 = vsyncpa [#allocation9 + $0x1], 0  ;;  %s1971_s29 = smov 0   ;;  %s1973_s30 = smov 0  }
  0x14   :  { %s1975_s15 = smov 0   ;;  %s1977_s16 = smov 0  }
  0x15   :  { %s1979_s17 = smov 0   ;;  %s1981_s18 = smov 0  }
  0x16 LB: > { %2322 = sst [smem:[#allocation25_spill]] %s1860_s29  ;;  %s2002_s19 = sadd.s32 4294967295, %s1880_s18   ;;  %s1880_s18 = sphi %s1981_s18, %s35_s18   ;;  %s1876_s17 = sphi %s1979_s17, %s2361_s17   ;;  %s1872_s16 = sphi %s1977_s16, %s2360_s16   ;;  %s1868_s15 = sphi %s1975_s15, %s2356_s15   ;;  %s1864_s30 = sphi %s1973_s30, %s2359_s30   ;;  %s1860_s29 = sphi %s1971_s29, %s2358_s29  }
  0x17   : > { %2323 = sst [smem:[#allocation26_spill]] %s1868_s15  ;;  %p1349_p0 = scmp.ge.s32.totalorder %s1880_s18, 1 }
  0x18   : > { %2324 = sst [smem:[#allocation27_spill]] %s1880_s18  ;;  %p70_p1 = scmp.eq.s32.totalorder %s2002_s19, 0 }
  0x19   : > { %p396_p2 = scmp.lt.s32.totalorder %s1880_s18, 3  ;;  %s2325_s4 = sld [smem:[#allocation35_spill]] }
  0x1a   : > { %s1882_s24 = smov [#allocation13]   ;;  %s2328_s8 = sld [smem:[#allocation37_spill]] }
  0x1b   : > { %p2010_p3 = pnand %p1349_p0, %p396_p2  ;;  %s415_s25 = sshll.u32 %s1882_s24, 4  ;;  %s416_s25 = int_to_ptr.vmem [resolvable:$true] %s415_s25 }
  0x1c   : > { %s2297_s21 = smov 64   ;;  %s2299_s24 = smov 4  }
  0x1d   : > { %p1450_p4 = pneg %p2010_p3  ;;  %s1348_s27 = sadd.s32 4294967294, %s1880_s18  }
  0x1e   : > { %s47_s28 = sadd.s32 1, %s1876_s17  ;;  %p63_p8 = scmp.ne.s32.totalorder %s1868_s15, %s1864_s30 }
  0x1f   : > { %s413_s22 = sshll.u32 %s2325_s4, 4  ;;  %p2018_p5 = pnand %p1450_p4, %p70_p1  ;;  %s414_s22 = int_to_ptr.hbm [resolvable:$true] %s413_s22 }
  0x20   : > { %s447_s20 = sshll.u32 %s2328_s8, 4  ;;  %s1885_s4 = smov [#allocation16]   ;;  %s448_s20 = int_to_ptr.hbm [resolvable:$true] %s447_s20 }
  0x21   : > { %1453 = dma.hbm_to_vmem [thread:$0]  (!%p2018_p5), %s414_s22, 256, %s416_s25, [#allocation14], %s2297_s21, %s2297_s21, %s2299_s24  }
  0x22   : > { %s449_s13 = sshll.u32 %s1885_s4, 4  ;;  %p49_p7 = scmp.ge.s32.totalorder %s47_s28, 2  ;;  %s450_s13 = int_to_ptr.vmem [resolvable:$true] %s449_s13 }
  0x23   : > { %1459 = dma.hbm_to_vmem [thread:$0]  (!%p2018_p5), %s448_s20, 256, %s450_s13, [#allocation17], %s2297_s21, %s2297_s21, %s2299_s24  }
  0x24   : > { %s56_s8 = sadd.s32 1, %s1868_s15  ;;  %p64_p9 = scmp.eq.s32.totalorder %s1880_s18, 0 }
  0x25   : > { %s2363_s28 = smov (%p49_p7, %s47_s28), 0  ;;  %p69_p11 = scmp.ne.s32.totalorder %s1864_s30, %s1860_s29 }
  0x26   : > { %2329 = sst [smem:[#allocation28_spill]] %s2363_s28  ;;  %p2044_p10 = por %p64_p9, %p63_p8 }
  0x27   : > { %s51_s13 = ssub.s32 %s1876_s17, %s2363_s28  ;;  %p383_p12 = scmp.eq.s32.totalorder %s2002_s19, 1 }
  0x28   : > { %p54_p13 = scmp.eq.s32.totalorder %s51_s13, 0  ;;  %p2055_p0 = por %p70_p1, %p69_p11 }
  0x29   : > { %p2059_p2 = por %p383_p12, %p63_p8  ;;  %p389_p4 = scmp.eq.s32.totalorder %s1348_s27, 1 }
  0x2a   : > { %s2064_s20 = scalar_select %p54_p13, %s1868_s15, %s56_s8  }
  0x2b   : > { %s2332_s25 = scalar_select %p2059_p2, 1, 0 }
  0x2c   : > { %2334 = sst [smem:[#allocation30_spill]] %s2064_s20  ;;  %p2066_p7 = por %p389_p4, %p69_p11 }
  0x2d   : > { %2333 = sst [smem:[#allocation29_spill]] %s2332_s25  ;;  %p1481_p9 = scmp.lt.s32.totalorder %s1880_s18, 2 }
  0x2e   : > { %s2335_s21 = scalar_select %p2066_p7, 1, 0 }
  0x2f   : > { %s2072_s24 = sand.u32 1, %s1868_s15   ;;  %s509_s13 = sand.u32 1, %s1880_s18  }
  0x30   : > { %2336 = sst [smem:[#allocation31_spill]] %s2335_s21  ;;  %p2077_p6 = pnand %p1481_p9, %p2044_p10 }
  0x31   : > { %s2310_s29 = sshll.u32 %s2072_s24, 2  ;;  %s1358_s27 = sshll.u32 %s1876_s17, 2 }
  0x32   : > { %s2338_s1 = sld [smem:[#allocation32_spill]]  ;;  %s513_s21 = scalar_lea.vmem [#allocation10], %s2310_s29 }
  0x33   : > { %s521_s15 = sshll.u32 %s513_s21, 4  ;;  %s2088_s4 = scalar_lea.sflag [#allocation11], %s509_s13  ;;  %s522_s15 = int_to_ptr.vmem [resolvable:$true] %s521_s15 }
  0x34   : > { %s2339_s2 = sld [smem:[#allocation33_spill]]  ;;  %s1886_s21 = smov [#allocation15]  }
  0x35   : > { %s2340_s6 = sld [smem:[#allocation36_spill]]  ;;  %s464_s13 = sshll.u32 %s2292_s10, 4  ;;  %s465_s13 = int_to_ptr.hbm [resolvable:$true] %s464_s13 }
  0x36   : > { %s2341_s3 = smov 4   ;;  %s1887_s12 = smov [#allocation18]  }
  0x37   : > { %s1356_s9 = sshll.u32 %s1876_s17, 3  ;;  %s2343_s26 = sshll.u32 %s2072_s24, 2 }
  0x38   : > { %s517_s25 = scalar_lea.hbm %s2338_s1, %s1358_s27  ;;  %s466_s1 = sshll.u32 %s1887_s12, 4  ;;  %s467_s1 = int_to_ptr.vmem [resolvable:$true] %s466_s1 }
  0x39   : > { %s519_s14 = sshll.u32 %s517_s25, 4  ;;  %s432_s25 = sshll.u32 %s1886_s21, 4  ;;  %s520_s14 = int_to_ptr.hbm [resolvable:$true] %s519_s14  ;;  %s433_s25 = int_to_ptr.vmem [resolvable:$true] %s432_s25 }
  0x3a   : > { %1469 = dma.hbm_to_vmem [thread:$0]  (!%p2077_p6), %s520_s14, 64, %s522_s15, %s2088_s4  }
  0x3b   : > { %s536_s20 = scalar_lea.hbm %s2339_s2, %s1358_s27  ;;  %s430_s29 = sshll.u32 %s2340_s6, 4  ;;  %s431_s29 = int_to_ptr.hbm [resolvable:$true] %s430_s29 }
  0x3c   : > { %s2342_s14 = smov 64   ;;  %s1355_s15 = sshll.u32 %s2072_s24, 3 }
  0x3d   : > { %1456 = dma.hbm_to_vmem [thread:$0]  (!%p2018_p5), %s431_s29, 256, %s433_s25, [#allocation14], %s2342_s14, %s2342_s14, %s2341_s3  }
  0x3e   : > { %1462 = dma.hbm_to_vmem [thread:$0]  (!%p2018_p5), %s465_s13, 256, %s467_s1, [#allocation17], %s2342_s14, %s2342_s14, %s2341_s3  }
  0x3f   : > { %s493_s11 = scalar_lea.vmem [#allocation7], %s1355_s15  ;;  %s498_s29 = scalar_lea.hbm %s2282_s0, %s1356_s9 }
  0x40   : > { %s502_s18 = sshll.u32 %s493_s11, 4  ;;  %s500_s21 = sshll.u32 %s498_s29, 4  ;;  %s503_s18 = int_to_ptr.vmem [resolvable:$true] %s502_s18  ;;  %s501_s21 = int_to_ptr.hbm [resolvable:$true] %s500_s21 }
  0x41   : > { %s538_s25 = sshll.u32 %s536_s20, 4  ;;  %s490_s12 = scalar_lea.sflag [#allocation8], %s2072_s24  ;;  %s539_s25 = int_to_ptr.hbm [resolvable:$true] %s538_s25 }
  0x42   : > { %1466 = dma.hbm_to_vmem [thread:$0]  (!%p2077_p6), %s501_s21, 128, %s503_s18, %s490_s12  }
  0x43   : > { %s532_s2 = scalar_lea.vmem [#allocation12], %s2343_s26  ;;  %549 = sbr.rel (%p2010_p3) target bundleno = 1432 (0x598), region = 76 }
  0x44   : > { %s540_s6 = sshll.u32 %s532_s2, 4  ;;  %s2128_s3 = sand.u32 (!%p2010_p3), 1, %s1864_s30   ;;  %s541_s6 = int_to_ptr.vmem [resolvable:$true] %s540_s6 }
  0x45   : > { %1472 = dma.hbm_to_vmem [thread:$0]  (!%p2077_p6), %s539_s25, 64, %s541_s6, %s2088_s4  }
  0x46   : > { %s1362_s20 = sshll.u32 (!%p2010_p3), %s2128_s3, 3  ;;  %s552_s13 = scalar_lea.sflag (!%p2010_p3), [#allocation8], %s2128_s3 }
  0x47   : > { %s555_s14 = scalar_lea.vmem (!%p2010_p3), [#allocation7], %s1362_s20 }
  0x48   : > { %1839 = dma.done.wait (%p2055_p0), %s552_s13, 128  }
  0x49   : > { %1841 = vsyncadd (%p2055_p0), %s552_s13, 4294967168  ;;  %s561_s2 = sand.u32 1, %s2002_s19   ;;  %s1363_s6 = sshll.u32 %s2128_s3, 2 }
  0x4a   : > { %s562_s23 = scalar_lea.sflag [#allocation11], %s561_s2  ;;  %s565_s24 = scalar_lea.vmem [#allocation10], %s1363_s6 }
  0x4b   : > { %1843 = dma.done.wait (%p2055_p0), %s562_s23, 128  }
  0x4c   : > { %1845 = vsyncadd (%p2055_p0), %s562_s23, 4294967168  ;;  %s2144_s28 = scalar_lea.vmem [#allocation12], %s1363_s6 }
  0x4d   : > { %1847 = dma.done.wait (%p70_p1), [#allocation14], 512  }
  0x4e   : > { %1849 = vsyncadd (%p70_p1), [#allocation14], 4294966784 }
  0x4f   : > { %1851 = dma.done.wait (%p70_p1), [#allocation17], 512  }
  0x50   : > { %1853 = vsyncadd (%p70_p1), [#allocation17], 4294966784  ;;  %v1419_v0 = vld [vmem:[#allocation15 + $0x8] sm:$0xff]  ;;  %v1423_v1 = vld [vmem:[#allocation13 + $0x8] sm:$0xff]  ;;  %vm683_vm0 = vcmask 261120   ;;  %vm738_vm1 = vcmask 60416  }
  0x51   : > { %v1418_v2 = vld [vmem:[#allocation15] sm:$0xff]  ;;  %v1422_v3 = vld [vmem:[#allocation13] sm:$0xff]  ;;  %693 = vmatpush.bf16.msra.mxu0 %v1419_v0  ;;  %811 = vmatpush.bf16.msra.mxu2 %v1423_v1  ;;  %v1549_v7 = vld [vmem:[%s2289_s7] ss:$0 sm:$0xff]  ;;  %s1888_s15 = smov 120   ;;  %s1889_s9 = smov 104  }
  0x52   : > { %v2154_v4 = vld [vmem:[%s555_s14] sm:$0xff]  ;;  %v662_v6 = vld [vmem:[%s565_s24] sm:$0xf]  ;;  %vm854_vm2 = vcmask 64512   ;;  %s1890_s11 = smov 112   ;;  %p654_p1 = scmp.lt.s32.totalorder %s1872_s16, 1 }
  0x53   : > { %v780_v5 = vpack.c.bf16 %v2154_v4, %v2154_v4  ;;  %v1550_v11 = vld [vmem:[%s2287_s5] ss:$0 sm:$0xff]  ;;  %v1420_v22 = vld [vmem:[#allocation16] sm:$0xff]  ;;  %v700_v23 = vld [vmem:[%s2144_s28] sm:$0xf]  ;;  %s2344_s29 = sld [smem:[#allocation34_spill]] }
  0x54   : > { %v1421_v21 = vld [vmem:[#allocation16 + $0x8] sm:$0xff]  ;;  %s655_s18 = scalar_select %p654_p1, %s1872_s16, 1  ;;  %vm777_vm3 = vcmask 57344   ;;  %v1891_v27 = vmov 0.0   ;;  %vm982_vm5 = vcmask 1043456   ;;  %vm1063_vm6 = vcmask 126016  }
  0x55   : > { %694 = vmatpush.bf16.msra.mxu0 %v1418_v2  ;;  %812 = vmatpush.bf16.msra.mxu2 %v1422_v3  ;;  %s2345_s26 = sld [smem:[#allocation38_spill]]  ;;  %s1892_s13 = smov 8   ;;  %vm1070_vm7 = vcmask 191616   ;;  %vm1077_vm8 = vcmask 257216  }
  0x56   : > { %730 = vmatpush.bf16.msra.mxu1 %v1421_v21  ;;  %s1893_s14 = smov 16   ;;  %s1894_s2 = smov 24  }
  0x57   : > { %s2346_s24 = sld [smem:[#allocation39_spill]]  ;;  %s1415_s28 = sshll.u32 %s1872_s16, 3 }
  0x58   : > { %1378 = vmatmul.msk.bf16.vlgmr.msra.gmra.mxu0 %vm683_vm0, %v662_v6  ;;  %1396 = vmatmul.msk.bf16.vlgmr.msra.gmra.mxu2 %vm683_vm0, %v780_v5  ;;  %s2347_s4 = sld [smem:[#allocation40_spill]]  ;;  %s653_s16 = scalar_lea.vmem [#allocation19], %s1362_s20 }
  0x59   : > { %s656_s21 = scalar_lea.vmem %s2344_s29, %s655_s18  ;;  %s2350_s29 = sld [smem:[#allocation41_spill]] }
  0x5a   : > { %731 = vmatpush.bf16.msra.mxu1 %v1420_v22  ;;  %v774_v26 = vld [vmem:[%s656_s21] sm:$0x1]  ;;  %s1171_s21 = sshll.u32 %s653_s16, 4  ;;  %s1158_s12 = scalar_lea.sflag [#allocation9], %s2128_s3  ;;  %s1172_s21 = int_to_ptr.vmem [resolvable:$true] %s1171_s21 }
  0x5b   : > { %vm775_vm4 = vcmp.eq.f32.partialorder %v774_v26, 0.0  ;;  %v1552_v44 = vld [vmem:[%s2345_s26] ss:$0 sm:$0xff] }
  0x5c   : > { %v776_v28 = vsel %vm775_vm4, -1e+09, %v1891_v27 }
  0x5d   : > { %1387 = vmatmul.msk.bf16.vlgmr.msra.gmra.mxu1 %vm683_vm0, %v700_v23  ;;  %778 = vst.msk [vmem:[#allocation6] sm:$0x1] %vm777_vm3, %v776_v28 }
  0x64   : > { %v1551_v50 = vld [vmem:[#allocation6] ss:$0 sm:$0xff] }
  0xd5   : > { %v696_v8 = vpop.f32.mrf.mxu0 }
  0xd6   : > { %v697_v9 = vadd.f32 %v1549_v7, %v696_v8 }
  0xd8   : > { %v737_v10 = vpack.c.bf16 %v697_v9, %v697_v9 }
  0xda   : > { %739 = vst.msk [vmem:[#allocation2] sm:$0xf] %vm738_vm1, %v737_v10  ;;  %743 = vrot.lane.b32.xlu1 %v737_v10, %s1888_s15  ;;  %764 = vrot.lane.b32.xlu0 %v737_v10, %s1889_s9  ;;  %v733_v45 = vpop.f32.mrf.mxu1 }
  0xdb   : > { %v814_v12 = vpop.f32.mrf.mxu2  ;;  %v734_v46 = vadd.f32 %v1552_v44, %v733_v45 }
  0xdc   : > { %v815_v13 = vadd.f32 %v1550_v11, %v814_v12 }
  0xdd   : > { %v698_v14 = vpop.f32.mrf.mxu0  ;;  %v2198_v47 = vpack.c.bf16 %v734_v46, %v734_v46 }
  0xde   : > { %v818_v15 = vmul.f32 0.35355338, %v815_v13 }
  0xdf   : > { %741 = vst.msk [vmem:[#allocation3] sm:$0xf] %vm738_vm1, %v2198_v47 }
  0xe0   : > { %v819_v16 = vpack.c.bf16 %v818_v15, %v818_v15 }
  0xe1   : > { %v843_v17 = vld [vmem:[#allocation2] sm:$0xf] }
  0xe2   : > { %821 = vst.msk [vmem:[#allocation4] sm:$0xf] %vm738_vm1, %v819_v16  ;;  %823 = vrot.lane.b32.xlu2 %v819_v16, %s1888_s15  ;;  %754 = vrot.lane.b32.xlu1 %v737_v10, %s1890_s11  ;;  %v859_v18 = vsel %vm854_vm2, %v843_v17, 0  ;;  %v735_v48 = vpop.f32.mrf.mxu1 }
  0xe3   : > { %833 = vrot.lane.b32.xlu0 %v819_v16, %s1889_s9  ;;  %v816_v19 = vpop.f32.mrf.mxu2  ;;  %868 = vmatpush.bf16.xpose.msra.mxu3 %v859_v18 }
  0xe6   : > { %v847_v49 = vld [vmem:[#allocation3] sm:$0xf] }
  0xe7   : > { %v984_v51 = vsel %vm982_vm5, %v847_v49, 0 }
  0xe9   : > { %v839_v20 = vld [vmem:[#allocation4] sm:$0xf] }
  0xea   : > { %828 = vrot.lane.b32.xlu2 %v819_v16, %s1890_s11  ;;  %1397 = vmatmul.msk.bf16.vlgmr.msra.gmra.mxu3 %vm854_vm2, %v839_v20 }
  0xeb   : > { %993 = vmatpush.bf16.msrb.mxu3 %v984_v51 }
 0x13c   : > { %v824_v24 = vpop.permute.xlu2 %823 }
 0x13d   : > { %827 = vst.msk [vmem:[#allocation4 + $0x4] sm:$0xf] %vm738_vm1, %v824_v24 }
 0x144   : > { %v829_v25 = vpop.permute.xlu2 %828  ;;  %v840_v37 = vld [vmem:[#allocation4 + $0x4] sm:$0xf] }
 0x145   : > { %832 = vst.msk [vmem:[#allocation4 + $0x8] sm:$0xf] %vm738_vm1, %v829_v25 }
 0x14c   : > { %v744_v29 = vpop.permute.xlu1 %743  ;;  %v765_v30 = vpop.permute.xlu0 %764  ;;  %v841_v41 = vld [vmem:[#allocation4 + $0x8] sm:$0xf] }
 0x14d   : > { %747 = vst.msk [vmem:[#allocation2 + $0x4] sm:$0xf] %vm738_vm1, %v744_v29 }
 0x14e   : > { %768 = vst.msk [vmem:[#allocation2 + $0xc] sm:$0xf] %vm738_vm1, %v765_v30 }
 0x154   : > { %v755_v31 = vpop.permute.xlu1 %754  ;;  %v844_v32 = vld [vmem:[#allocation2 + $0x4] sm:$0xf] }
 0x155   : > { %758 = vst.msk [vmem:[#allocation2 + $0x8] sm:$0xf] %vm738_vm1, %v755_v31  ;;  %v834_v33 = vpop.permute.xlu0 %833  ;;  %v878_v34 = vsel %vm854_vm2, %v844_v32, 0  ;;  %v846_v35 = vld [vmem:[#allocation2 + $0xc] sm:$0xf] }
 0x156   : > { %837 = vst.msk [vmem:[#allocation4 + $0xc] sm:$0xf] %vm738_vm1, %v834_v33  ;;  %887 = vmatpush.bf16.xpose.msrb.mxu0 %v878_v34  ;;  %v916_v36 = vsel %vm854_vm2, %v846_v35, 0 }
 0x157   : > { %925 = vmatpush.bf16.xpose.msrb.mxu2 %v916_v36 }
 0x15c   : > { %v845_v38 = vld [vmem:[#allocation2 + $0x8] sm:$0xf] }
 0x15d   : > { %1398 = vmatmul.msk.bf16.vlgmr.msrb.gmra.mxu0 %vm854_vm2, %v840_v37  ;;  %v842_v39 = vld [vmem:[#allocation4 + $0xc] sm:$0xf]  ;;  %v897_v40 = vsel %vm854_vm2, %v845_v38, 0 }
 0x15e   : > { %1400 = vmatmul.msk.bf16.vlgmr.msrb.gmra.mxu2 %vm854_vm2, %v842_v39  ;;  %906 = vmatpush.bf16.xpose.msrb.mxu1 %v897_v40 }
 0x165   : > { %1399 = vmatmul.msk.bf16.vlgmr.msrb.gmra.mxu1 %vm854_vm2, %v841_v41 }
 0x16d   : > { %v870_v42 = vpop.f32.mrf.mxu3 }
 0x16e   : > { %v871_v62 = vadd.f32 %v1551_v50, %v870_v42 }
 0x170   : > { %v931_v1 = vsel %vm854_vm2, %v871_v62, -inf }
 0x175   : > { %v872_v43 = vpop.f32.mrf.mxu3 }
 0x1da   : > { %v889_v52 = vpop.f32.mrf.mxu0 }
 0x1db   : > { %v890_v53 = vadd.f32 %v1551_v50, %v889_v52 }
 0x1dd   : > { %v934_v54 = vsel %vm854_vm2, %v890_v53, -inf }
 0x1de   : > { %935 = vmax.xlane.f32.xlu1 %v934_v54 }
 0x1e1   : > { %v927_v55 = vpop.f32.mrf.mxu2 }
 0x1e2   : > { %v928_v56 = vadd.f32 %v1551_v50, %v927_v55  ;;  %v891_v57 = vpop.f32.mrf.mxu0  ;;  %v908_v58 = vpop.f32.mrf.mxu1 }
 0x1e3   : > { %v909_v59 = vadd.f32 %v1551_v50, %v908_v58 }
 0x1e4   : > { %v940_v60 = vsel %vm854_vm2, %v928_v56, -inf }
 0x1e5   : > { %941 = vmax.xlane.f32.xlu0 %v940_v60  ;;  %v937_v61 = vsel %vm854_vm2, %v909_v59, -inf }
 0x1e6   : > { %938 = vmax.xlane.f32.xlu2 %v937_v61  ;;  %v1425_v61 = vld [vmem:[#allocation18 + $0x8] sm:$0xff] }
 0x1e7   : > { %1109 = vmatpush.bf16.msra.mxu3 %v1425_v61 }
 0x1e9   : > { %v929_v63 = vpop.f32.mrf.mxu2 }
 0x1ea   : > { %v910_v0 = vpop.f32.mrf.mxu1 }
 0x1ee   : > { %932 = vmax.xlane.f32.xlu2 %v931_v1 }
 0x1f9   : > { %769 = vrot.lane.b32.xlu0 %v2198_v47, %s1889_s9  ;;  %s2348_s9 = sld [smem:[#allocation42_spill]] }
 0x1ff   : > { %s1806_s20 = scalar_lea.hbm %s2348_s9, 16 }
 0x206   : > { %749 = vrot.lane.b32.xlu2 %v2198_v47, %s1888_s15 }
 0x251   : > { %v936_v2 = vpop.xlane.xlu1 %935 }
 0x252   : > { %v944_v3 = vsub.f32 %v890_v53, %v936_v2  ;;  %v1553_v2 = vld [vmem:[%s2346_s24] ss:$0 sm:$0xff] }
 0x254   : > { %v949_v5 = vmul.f32 1.442695, %v944_v3 }
 0x256   : > { %1556 = vpow2.f32 %v949_v5 }
 0x258   : > { %v942_v6 = vpop.xlane.xlu0 %941 }
 0x259   : > { %v946_v7 = vsub.f32 %v928_v56, %v942_v6  ;;  %v939_v8 = vpop.xlane.xlu2 %938 }
 0x25a   : > { %v945_v9 = vsub.f32 %v909_v59, %v939_v8 }
 0x25b   : > { %v953_v10 = vmul.f32 1.442695, %v946_v7 }
 0x25c   : > { %v1557_v11 = vpop.eup %1556  ;;  %v951_v12 = vmul.f32 1.442695, %v945_v9  ;;  %v1895_v9 = vmov 32.0  }
 0x25d   : > { %1558 = vpow2.f32 %v953_v10  ;;  %v958_v13 = vsel %vm854_vm2, %v1557_v11, 0.0 }
 0x25e   : > { %1560 = vpow2.f32 %v951_v12  ;;  %959 = vadd.xlane.f32.xlu1 %v958_v13 }
 0x261   : > { %v933_v14 = vpop.xlane.xlu2 %932 }
 0x262   : > { %v943_v15 = vsub.f32 %v871_v62, %v933_v14  ;;  %v1424_v62 = vld [vmem:[#allocation18] sm:$0xff] }
 0x263   : > { %v1559_v16 = vpop.eup %1558  ;;  %1110 = vmatpush.bf16.msra.mxu3 %v1424_v62 }
 0x264   : > { %v1561_v17 = vpop.eup %1560  ;;  %v947_v18 = vmul.f32 1.442695, %v943_v15  ;;  %v964_v20 = vsel %vm854_vm2, %v1559_v16, 0.0 }
 0x265   : > { %v961_v19 = vsel %vm854_vm2, %v1561_v17, 0.0 }
 0x266   : > { %1562 = vpow2.f32 %v947_v18  ;;  %962 = vadd.xlane.f32.xlu0 %v961_v19  ;;  %965 = vadd.xlane.f32.xlu1 %v964_v20 }
 0x269   : > { %v750_v21 = vpop.permute.xlu2 %749 }
 0x26a   : > { %753 = vst.msk [vmem:[#allocation3 + $0x4] sm:$0xf] %vm738_vm1, %v750_v21 }
 0x26b   : > { %v770_v22 = vpop.permute.xlu0 %769 }
 0x26c   : > { %v1563_v23 = vpop.eup %1562  ;;  %773 = vst.msk [vmem:[#allocation3 + $0xc] sm:$0xf] %vm738_vm1, %v770_v22 }
 0x26d   : > { %v955_v24 = vsel %vm854_vm2, %v1563_v23, 0.0 }
 0x26e   : > { %956 = vadd.xlane.f32.xlu2 %v955_v24 }
 0x271   : > { %v848_v25 = vld [vmem:[#allocation3 + $0x4] sm:$0xf] }
 0x272   : > { %v1003_v26 = vsel %vm982_vm5, %v848_v25, 0 }
 0x273   : > { %1012 = vmatpush.bf16.msra.mxu0 %v1003_v26  ;;  %v850_v27 = vld [vmem:[#allocation3 + $0xc] sm:$0xf] }
 0x274   : > { %v1041_v28 = vsel %vm982_vm5, %v850_v27, 0 }
 0x275   : > { %1050 = vmatpush.bf16.msra.mxu2 %v1041_v28 }
 0x27f   : > { %759 = vrot.lane.b32.xlu1 %v2198_v47, %s1890_s11  ;;  %s1169_s11 = scalar_lea.hbm %s2348_s9, %s1415_s28 }
 0x280   : > { %s1173_s25 = sshll.u32 %s1169_s11, 4  ;;  %s1174_s25 = int_to_ptr.hbm [resolvable:$true] %s1173_s25 }
 0x281   : > { %s1800_s26 = sshra.s32 %s1174_s25, 4  ;;  %s1801_s26 = int_to_ptr.hbm [resolvable:$true] %s1800_s26 }
 0x282   : > { %p1807_p8 = scmp.lt.s32.totalorder %s1801_s26, %s2348_s9 }
 0x2d1   : > { %v960_v29 = vpop.xlane.xlu1 %959 }
 0x2d2   : > { %1564 = vrcp.f32 %v960_v29  ;;  %v1554_v29 = vld [vmem:[%s2347_s4] ss:$0 sm:$0xff] }
 0x2d8   : > { %v1565_v30 = vpop.eup %1564 }
 0x2d9   : > { %v972_v31 = vmul.f32 %v1565_v30, %v1557_v11  ;;  %v966_v32 = vpop.xlane.xlu1 %965  ;;  %v963_v41 = vpop.xlane.xlu0 %962 }
 0x2da   : > { %1566 = vrcp.f32 %v966_v32  ;;  %v1555_v32 = vld [vmem:[%s2350_s29] ss:$0 sm:$0xff] }
 0x2db   : > { %v976_v33 = vpack.c.bf16 %v972_v31, %v972_v31 }
 0x2dd   : > { %1402 = vmatmul.msk.bf16.vlgmr.msra.gmra.mxu0 %vm854_vm2, %v976_v33 }
 0x2e0   : > { %v1567_v34 = vpop.eup %1566 }
 0x2e1   : > { %v974_v35 = vmul.f32 %v1567_v34, %v1559_v16  ;;  %v957_v36 = vpop.xlane.xlu2 %956 }
 0x2e2   : > { %1568 = vrcp.f32 %v957_v36 }
 0x2e3   : > { %v978_v37 = vpack.c.bf16 %v974_v35, %v974_v35  ;;  %1570 = vrcp.f32 %v963_v41 }
 0x2e4   : > { %1572 = vrcp.f32 %v1895_v9 }
 0x2e5   : > { %1404 = vmatmul.msk.bf16.vlgmr.msra.gmra.mxu2 %vm854_vm2, %v978_v37 }
 0x2e8   : > { %v1569_v38 = vpop.eup %1568 }
 0x2e9   : > { %v971_v39 = vmul.f32 %v1569_v38, %v1563_v23  ;;  %v1571_v43 = vpop.eup %1570 }
 0x2ea   : > { %v973_v44 = vmul.f32 %v1571_v43, %v1561_v17  ;;  %v1573_v10 = vpop.eup %1572 }
 0x2eb   : > { %v975_v40 = vpack.c.bf16 %v971_v39, %v971_v39  ;;  %v1121_v11 = vmul.f32 32.0, %v1573_v10  ;;  %vm1125_vm9 = vweird.f32 %v1573_v10 }
 0x2ec   : > { %v977_v47 = vpack.c.bf16 %v973_v44, %v973_v44 }
 0x2ed   : > { %1401 = vmatmul.msk.bf16.vlgmr.msrb.gmra.mxu3 %vm854_vm2, %v975_v40  ;;  %v1122_v12 = vsub.f32 1.0, %v1121_v11 }
 0x2ef   : > { %v1123_v13 = vmul.f32 %v1573_v10, %v1122_v12 }
 0x2f1   : > { %v760_v42 = vpop.permute.xlu1 %759  ;;  %v1124_v14 = vadd.f32 %v1573_v10, %v1123_v13 }
 0x2f2   : > { %763 = vst.msk [vmem:[#allocation3 + $0x8] sm:$0xf] %vm738_vm1, %v760_v42 }
 0x2f3   : > { %v1126_v15 = vsel %vm1125_vm9, %v1573_v10, %v1124_v14 }
 0x2f9   : > { %v849_v45 = vld [vmem:[#allocation3 + $0x8] sm:$0xf] }
 0x2fa   : > { %v1022_v46 = vsel %vm982_vm5, %v849_v45, 0 }
 0x2fb   : > { %1031 = vmatpush.bf16.msra.mxu1 %v1022_v46 }
 0x2fe   : > { %1403 = vmatmul.msk.bf16.vlgmr.msra.gmra.mxu1 %vm854_vm2, %v977_v47 }
 0x35a   : > { %v1014_v48 = vpop.f32.mrf.mxu0 }
 0x35b   : > { %v1058_v49 = vpack.c.bf16 %v1014_v48, %v1014_v48 }
 0x35d   : > { %1060 = vrot.lane.b32.xlu1 %v1058_v49, %s1892_s13  ;;  %s1802_s13 = scalar_lea.hbm %s1801_s26, 8 }
 0x35e   : > { %p1803_p3 = scmp.ne.s32.totalorder %s1801_s26, %s1802_s13  ;;  %p1808_p10 = scmp.lt.s32.totalorder %s1806_s20, %s1802_s13 }
 0x360   : > { %p1804_p5 = pnand %p1803_p3, %p2059_p2  ;;  %p1809_p11 = por %p1808_p10, %p1807_p8 }
 0x362   : > { %v1016_v50 = vpop.f32.mrf.mxu0  ;;  %p1805_p6 = pneg %p1804_p5 }
 0x364   : > { %p1810_p12 = pnand %p1809_p11, %p1805_p6 }
 0x368   : > { %v1052_v51 = vpop.f32.mrf.mxu2 }
 0x369   : > { %v1072_v59 = vpack.c.bf16 %v1052_v51, %v1052_v51 }
 0x370   : > { %v995_v52 = vpop.f32.mrf.mxu3  ;;  %v1054_v53 = vpop.f32.mrf.mxu2 }
 0x371   : > { %v1056_v54 = vpack.c.bf16 %v995_v52, %v995_v52 }
 0x373   : > { %1057 = vst.msk [vmem:[#allocation5] sm:$0xf] %vm738_vm1, %v1056_v54 }
 0x378   : > { %v997_v55 = vpop.f32.mrf.mxu3 }
 0x37b   : > { %v1033_v56 = vpop.f32.mrf.mxu1 }
 0x37c   : > { %v1065_v57 = vpack.c.bf16 %v1033_v56, %v1033_v56 }
 0x37e   : > { %1067 = vrot.lane.b32.xlu1 %v1065_v57, %s1893_s14 }
 0x383   : > { %v1035_v58 = vpop.f32.mrf.mxu1 }
 0x386   : > { %1074 = vrot.lane.b32.xlu1 %v1072_v59, %s1894_s2 }
 0x3cf   : > { %v1061_v60 = vpop.permute.xlu1 %1060 }
 0x3d0   : > { %1064 = vst.msk [vmem:[#allocation5] sm:$0xf] %vm1063_vm6, %v1061_v60 }
 0x3f0   : > { %v1068_v63 = vpop.permute.xlu1 %1067 }
 0x3f1   : > { %1071 = vst.msk [vmem:[#allocation5] sm:$0xf] %vm1070_vm7, %v1068_v63 }
 0x3f8   : > { %v1075_v0 = vpop.permute.xlu1 %1074 }
 0x3f9   : > { %1078 = vst.msk [vmem:[#allocation5] sm:$0xf] %vm1077_vm8, %v1075_v0 }
 0x400   : > { %v1079_v1 = vld [vmem:[#allocation5] sm:$0xf] }
 0x401   : > { %1413 = vmatmul.msk.bf16.vlgmr.msra.gmra.mxu3 %vm683_vm0, %v1079_v1 }
 0x484   : > { %v1112_v3 = vpop.f32.mrf.mxu3 }
 0x485   : > { %v1113_v5 = vadd.f32 %v1553_v2, %v1112_v3 }
 0x487   : > { %v1116_v6 = vadd.f32 %v1113_v5, %v2154_v4 }
 0x489   : > { %v1117_v7 = vsel %vm683_vm0, %v1116_v6, 0.0 }
 0x48a   : > { %1118 = vadd.xlane.f32.xlu0 %v1117_v7 }
 0x48c   : > { %v1114_v8 = vpop.f32.mrf.mxu3 }
 0x4fd   : > { %v1119_v16 = vpop.xlane.xlu0 %1118 }
 0x4fe   : > { %v1127_v17 = vmul.f32 %v1126_v15, %v1119_v16 }
 0x500   : > { %v1128_v18 = vsub.f32 %v1116_v6, %v1127_v17 }
 0x502   : > { %v1129_v19 = vmul.f32 %v1128_v18, %v1128_v18 }
 0x504   : > { %v1130_v4 = vsel %vm683_vm0, %v1129_v19, 0.0 }
 0x505   : > { %1131 = vadd.xlane.f32.xlu1 %v1130_v4 }
 0x578   : > { %v1132_v20 = vpop.xlane.xlu1 %1131 }
 0x579   : > { %v1133_v21 = vmul.f32 %v1132_v20, %v1126_v15 }
 0x57b   : > { %v1134_v22 = vadd.f32 1e-06, %v1133_v21 }
 0x57d   : > { %1574 = vrsqrt.f32 %v1134_v22  ;;  %vm1141_vm11 = vweird.f32 %v1134_v22 }
 0x583   : > { %v1575_v23 = vpop.eup %1574 }
 0x584   : > { %v1136_v24 = vmul.f32 %v1575_v23, %v1134_v22  ;;  %vm1142_vm10 = vweird.f32 %v1575_v23 }
 0x585   : > { %vm1143_vm12 = vmor %vm1141_vm11, %vm1142_vm10 }
 0x586   : > { %v1137_v25 = vmul.f32 %v1575_v23, %v1136_v24 }
 0x588   : > { %v1138_v26 = vmul.f32 0.5, %v1137_v25 }
 0x58a   : > { %v1139_v27 = vsub.f32 1.5, %v1138_v26 }
 0x58c   : > { %v1140_v28 = vmul.f32 %v1575_v23, %v1139_v27 }
 0x58e   : > { %v1144_v30 = vsel %vm1143_vm12, %v1575_v23, %v1140_v28 }
 0x58f   : > { %v1145_v31 = vmul.f32 %v1144_v30, %v1128_v18 }
 0x591   : > { %v1150_v33 = vmul.f32 %v1554_v29, %v1145_v31 }
 0x593   : > { %v1155_v34 = vadd.f32 %v1555_v32, %v1150_v33 }
 0x595   : > { %1156 = vst.msk [vmem:[%s653_s16] sm:$0xff] %vm683_vm0, %v1155_v34 }
 0x596   : > { %1813 = shalt.err (!%p1810_p12)
}
 0x597   : > { %1448 = dma.vmem_to_hbm [thread:$0]  (%p2059_p2), %s1172_s21, 128, %s1174_s25, %s1158_s12  }
 0x598 PF: > { %s2351_s3 = sld [smem:[#allocation25_spill]] }
 0x599   : > { %s2353_s28 = sld [smem:[#allocation27_spill]] }
 0x59e   : > { %s1185_s19 = sand.u32 1, %s2351_s3  }
 0x59f   : > { %p2354_p13 = scmp.ge.s32.totalorder %s2353_s28, 2  ;;  %s1186_s22 = scalar_lea.sflag [#allocation9], %s1185_s19 }
 0x5a1   : > { %p1474_p0 = pnand %p2354_p13, %p2066_p7 }
 0x5a3   : > { %p1475_p4 = pneg %p1474_p0 }
 0x5a5   : > { %1855 = dma.done.wait (%p1475_p4), %s1186_s22, 128  }
 0x5a6   : > { %1857 = vsyncadd (%p1475_p4), %s1186_s22, 4294967168  ;;  %s35_s18 = sadd.s32 1, %s2353_s28   ;;  %s2355_s4 = sld [smem:[#allocation26_spill]] }
 0x5a7   : > { %p32_p9 = scmp.ge.s32.totalorder %s35_s18, 4   ;;  %s2356_s15 = sld [smem:[#allocation30_spill]] }
 0x5a8   : > { %s2357_s1 = sld [smem:[#allocation28_spill]]  ;;  %s2358_s29 = smov %s1864_s30 }
 0x5a9   : > { %s2360_s16 = smov %s1876_s17 }
 0x5aa   :  { %34 = sbr.rel (!%p32_p9) target bundleno = 22 (0x16), region = 177 }
 0x5ac   : > { %s2359_s30 = smov %s2355_s4 }
 0x5ae   : > { %s2361_s17 = smov %s2357_s1 }
 0x5af   :  { %1192 = vsyncpa [#allocation8], 1 }
 0x5b0   :  { %1194 = vsyncpa [#allocation8 + $0x1], 1 }
 0x5b1   :  { %1195 = vsyncpa [#allocation11], 1 }
 0x5b2   :  { %1197 = vsyncpa [#allocation11 + $0x1], 1 }
 0x5b3   :  { %1198 = vsyncpa [#allocation14], 1 }
 0x5b4   :  { %1199 = vsyncpa [#allocation17], 1 }
 0x5b5   :  { %1200 = vsyncpa [#allocation9], 1 }
 0x5b6   :  { %1202 = vsyncpa [#allocation9 + $0x1], 1 }

</bundles_post_ra>
